<compile_context>
chip_gen: v7x
topology: tpu7x:2x2x1
jax: 0.10.0
libtpu: 0.0.40
codegen_flags: <defaults>
</compile_context>

<pallas_src>
import jax
import jax.numpy as jnp
from jax.experimental import pallas as pl
from jax.experimental.pallas import tpu as pltpu  # noqa: F401  (TPU backend)

# Problem sizes (PyTorch module: x690 = randn(1, 128, 7, 7))
N, C_IN, H, W = 1, 128, 7, 7
C_OUT = 32
KH = KW = 3
PAD = 1

HP, WP = H + 2 * PAD, W + 2 * PAD          # 9, 9   padded raster
M_PAD = 64                                  # output raster rows: 7*9 = 63 -> 64
MAX_OFF = (KH - 1) * WP + (KW - 1)          # 20
ROWS = 96                                   # >= M_PAD + MAX_OFF (84), multiple of 16 (bf16 packing)
# tap (kh, kw) -> row offset in the flattened padded raster, tap-major (kh, kw) order
TAP_OFFSETS = tuple(kh * WP + kw for kh in range(KH) for kw in range(KW))


def conv3x3_kernel(x_ref, w_ref, o_ref):
    # x_ref: (ROWS, C_IN)          bf16  zero-padded, row-flattened NHWC image
    # w_ref: (KH*KW, C_IN, C_OUT)  bf16  tap-major weights (unpadded lanes)
    # o_ref: (M_PAD, C_OUT)        f32
    acc = jnp.zeros((M_PAD, C_OUT), jnp.float32)
    for t, off in enumerate(TAP_OFFSETS):
        # nine accumulated (64,128)x(128,32) bf16 MXU dots with f32 accumulation
        acc = acc + jnp.dot(x_ref[off:off + M_PAD, :], w_ref[t],
                            preferred_element_type=jnp.float32)
    o_ref[...] = acc


def prepare_conv_weights(weight_oihw):
    """One-time weight prep (hoisted off the forward path).

    (Cout, Cin, kh, kw) f32 -> (kh*kw, Cin, Cout) bf16, tap-major.
    """
    w_taps = jnp.transpose(weight_oihw, (2, 3, 1, 0))           # (3, 3, 128, 32)
    return w_taps.reshape(KH * KW, C_IN, C_OUT).astype(jnp.bfloat16)


def conv2d_195(x_nchw, w_taps):
    """x_nchw: (1, 128, 7, 7) f32, w_taps: (9, 128, 32) bf16 -> (1, 32, 7, 7) f32."""
    # ---- input prep: NCHW -> padded, row-flattened NHWC raster, bf16 (one small fusion)
    x_hwc = jnp.transpose(x_nchw[0], (1, 2, 0)).astype(jnp.bfloat16)   # (7, 7, 128)
    x_pad = jnp.pad(x_hwc, ((PAD, PAD), (PAD, PAD), (0, 0)))           # (9, 9, 128)
    x_flat = jnp.pad(x_pad.reshape(HP * WP, C_IN),
                     ((0, ROWS - HP * WP), (0, 0)))                    # (96, 128) bf16

    out_rows = pl.pallas_call(
        conv3x3_kernel,
        out_shape=jax.ShapeDtypeStruct((M_PAD, C_OUT), jnp.float32),
        in_specs=[
            pl.BlockSpec((ROWS, C_IN), lambda: (0, 0)),
            pl.BlockSpec((KH * KW, C_IN, C_OUT), lambda: (0, 0, 0)),
        ],
        out_specs=pl.BlockSpec((M_PAD, C_OUT), lambda: (0, 0)),
        cost_estimate=pl.CostEstimate(
            flops=2 * M_PAD * (KH * KW * C_IN) * C_OUT,
            transcendentals=0,
            bytes_accessed=ROWS * C_IN * 2 + KH * KW * C_IN * C_OUT * 2
                           + M_PAD * C_OUT * 4,
        ),
    )(x_flat, w_taps)

    # ---- output: rows q = h*9 + w (keep w < 7) -> NCHW (single small fusion)
    out_hwc = out_rows[:H * WP].reshape(H, WP, C_OUT)[:, :W, :]        # (7, 7, 32)
    return jnp.transpose(out_hwc, (2, 0, 1))[None]                     # (1, 32, 7, 7)


if __name__ == "__main__":
    key = jax.random.PRNGKey(0)
    kx, kw = jax.random.split(key)

    x = jax.random.normal(kx, (N, C_IN, H, W), dtype=jnp.float32)
    # PyTorch Conv2d weight shape (Cout, Cin, KH, KW); bias=False
    weight = jax.random.normal(kw, (C_OUT, C_IN, KH, KW), dtype=jnp.float32) * 0.05

    # Weight prep happens once, off the forward path.
    w_taps = jax.block_until_ready(prepare_conv_weights(weight))

    conv_fn = jax.jit(conv2d_195)
    out = jax.block_until_ready(conv_fn(x, w_taps))
    assert out.shape == (N, C_OUT, H, W)

    # Reference with the same bf16-input / f32-accumulate rounding model (tight check)
    ref_bf16 = jax.lax.conv_general_dilated(
        x.astype(jnp.bfloat16), weight.astype(jnp.bfloat16),
        window_strides=(1, 1), padding=((PAD, PAD), (PAD, PAD)),
        dimension_numbers=("NCHW", "OIHW", "NCHW"),
        preferred_element_type=jnp.float32)
    assert jnp.max(jnp.abs(out - ref_bf16)) < 2e-2

    # Loose relative check against the pure-f32 reference (inputs were bf16-rounded)
    ref_f32 = jax.lax.conv_general_dilated(
        x, weight, window_strides=(1, 1), padding=((PAD, PAD), (PAD, PAD)),
        dimension_numbers=("NCHW", "OIHW", "NCHW"))
    rel_err = jnp.max(jnp.abs(out - ref_f32)) / (jnp.max(jnp.abs(ref_f32)) + 1e-6)
    assert rel_err < 0.1

    print("KERNEL_OK")
</pallas_src>

<mosaic_0001>
module attributes {stable_mosaic.version = 11 : i64} {
  func.func @conv3x3_kernel(%arg0: memref<96x128xbf16, #tpu.memory_space<vmem>>, %arg1: memref<9x128x32xbf16, #tpu.memory_space<vmem>>, %arg2: memref<64x32xf32, #tpu.memory_space<vmem>>) attributes {dimension_semantics = [], scalar_prefetch = 0 : i64, scratch_operands = 0 : i64, tpu.core_type = #tpu.core_type<tc>} {
    %cst = arith.constant 0.000000e+00 : f32
    %0 = vector.broadcast %cst : f32 to vector<64x32xf32>
    %c0 = arith.constant 0 : index
    %c0_0 = arith.constant 0 : index
    %1 = vector.load %arg0[%c0, %c0_0] : memref<96x128xbf16, #tpu.memory_space<vmem>>, vector<64x128xbf16>
    %c0_1 = arith.constant 0 : index
    %c0_2 = arith.constant 0 : index
    %c0_3 = arith.constant 0 : index
    %2 = vector.load %arg1[%c0_1, %c0_2, %c0_3] : memref<9x128x32xbf16, #tpu.memory_space<vmem>>, vector<1x128x32xbf16>
    %3 = vector.shape_cast %2 : vector<1x128x32xbf16> to vector<128x32xbf16>
    %cst_4 = arith.constant dense<0.000000e+00> : vector<64x32xf32>
    %4 = tpu.matmul %1, %3, %cst_4 {dimension_numbers = #tpu.dot_dimension_numbers<[1], [0], [0], [1], [0, 0, 1, 1], [], []>} : vector<64x128xbf16>, vector<128x32xbf16>, vector<64x32xf32> -> vector<64x32xf32>
    %5 = arith.addf %0, %4 : vector<64x32xf32>
    %c1 = arith.constant 1 : index
    %c0_5 = arith.constant 0 : index
    %6 = vector.load %arg0[%c1, %c0_5] : memref<96x128xbf16, #tpu.memory_space<vmem>>, vector<64x128xbf16>
    %c1_6 = arith.constant 1 : index
    %c0_7 = arith.constant 0 : index
    %c0_8 = arith.constant 0 : index
    %7 = vector.load %arg1[%c1_6, %c0_7, %c0_8] : memref<9x128x32xbf16, #tpu.memory_space<vmem>>, vector<1x128x32xbf16>
    %8 = vector.shape_cast %7 : vector<1x128x32xbf16> to vector<128x32xbf16>
    %cst_9 = arith.constant dense<0.000000e+00> : vector<64x32xf32>
    %9 = tpu.matmul %6, %8, %cst_9 {dimension_numbers = #tpu.dot_dimension_numbers<[1], [0], [0], [1], [0, 0, 1, 1], [], []>} : vector<64x128xbf16>, vector<128x32xbf16>, vector<64x32xf32> -> vector<64x32xf32>
    %10 = arith.addf %5, %9 : vector<64x32xf32>
    %c2 = arith.constant 2 : index
    %c0_10 = arith.constant 0 : index
    %11 = vector.load %arg0[%c2, %c0_10] : memref<96x128xbf16, #tpu.memory_space<vmem>>, vector<64x128xbf16>
    %c2_11 = arith.constant 2 : index
    %c0_12 = arith.constant 0 : index
    %c0_13 = arith.constant 0 : index
    %12 = vector.load %arg1[%c2_11, %c0_12, %c0_13] : memref<9x128x32xbf16, #tpu.memory_space<vmem>>, vector<1x128x32xbf16>
    %13 = vector.shape_cast %12 : vector<1x128x32xbf16> to vector<128x32xbf16>
    %cst_14 = arith.constant dense<0.000000e+00> : vector<64x32xf32>
    %14 = tpu.matmul %11, %13, %cst_14 {dimension_numbers = #tpu.dot_dimension_numbers<[1], [0], [0], [1], [0, 0, 1, 1], [], []>} : vector<64x128xbf16>, vector<128x32xbf16>, vector<64x32xf32> -> vector<64x32xf32>
    %15 = arith.addf %10, %14 : vector<64x32xf32>
    %c9 = arith.constant 9 : index
    %c0_15 = arith.constant 0 : index
    %16 = vector.load %arg0[%c9, %c0_15] : memref<96x128xbf16, #tpu.memory_space<vmem>>, vector<64x128xbf16>
    %c3 = arith.constant 3 : index
    %c0_16 = arith.constant 0 : index
    %c0_17 = arith.constant 0 : index
    %17 = vector.load %arg1[%c3, %c0_16, %c0_17] : memref<9x128x32xbf16, #tpu.memory_space<vmem>>, vector<1x128x32xbf16>
    %18 = vector.shape_cast %17 : vector<1x128x32xbf16> to vector<128x32xbf16>
    %cst_18 = arith.constant dense<0.000000e+00> : vector<64x32xf32>
    %19 = tpu.matmul %16, %18, %cst_18 {dimension_numbers = #tpu.dot_dimension_numbers<[1], [0], [0], [1], [0, 0, 1, 1], [], []>} : vector<64x128xbf16>, vector<128x32xbf16>, vector<64x32xf32> -> vector<64x32xf32>
    %20 = arith.addf %15, %19 : vector<64x32xf32>
    %c10 = arith.constant 10 : index
    %c0_19 = arith.constant 0 : index
    %21 = vector.load %arg0[%c10, %c0_19] : memref<96x128xbf16, #tpu.memory_space<vmem>>, vector<64x128xbf16>
    %c4 = arith.constant 4 : index
    %c0_20 = arith.constant 0 : index
    %c0_21 = arith.constant 0 : index
    %22 = vector.load %arg1[%c4, %c0_20, %c0_21] : memref<9x128x32xbf16, #tpu.memory_space<vmem>>, vector<1x128x32xbf16>
    %23 = vector.shape_cast %22 : vector<1x128x32xbf16> to vector<128x32xbf16>
    %cst_22 = arith.constant dense<0.000000e+00> : vector<64x32xf32>
    %24 = tpu.matmul %21, %23, %cst_22 {dimension_numbers = #tpu.dot_dimension_numbers<[1], [0], [0], [1], [0, 0, 1, 1], [], []>} : vector<64x128xbf16>, vector<128x32xbf16>, vector<64x32xf32> -> vector<64x32xf32>
    %25 = arith.addf %20, %24 : vector<64x32xf32>
    %c11 = arith.constant 11 : index
    %c0_23 = arith.constant 0 : index
    %26 = vector.load %arg0[%c11, %c0_23] : memref<96x128xbf16, #tpu.memory_space<vmem>>, vector<64x128xbf16>
    %c5 = arith.constant 5 : index
    %c0_24 = arith.constant 0 : index
    %c0_25 = arith.constant 0 : index
    %27 = vector.load %arg1[%c5, %c0_24, %c0_25] : memref<9x128x32xbf16, #tpu.memory_space<vmem>>, vector<1x128x32xbf16>
    %28 = vector.shape_cast %27 : vector<1x128x32xbf16> to vector<128x32xbf16>
    %cst_26 = arith.constant dense<0.000000e+00> : vector<64x32xf32>
    %29 = tpu.matmul %26, %28, %cst_26 {dimension_numbers = #tpu.dot_dimension_numbers<[1], [0], [0], [1], [0, 0, 1, 1], [], []>} : vector<64x128xbf16>, vector<128x32xbf16>, vector<64x32xf32> -> vector<64x32xf32>
    %30 = arith.addf %25, %29 : vector<64x32xf32>
    %c18 = arith.constant 18 : index
    %c0_27 = arith.constant 0 : index
    %31 = vector.load %arg0[%c18, %c0_27] : memref<96x128xbf16, #tpu.memory_space<vmem>>, vector<64x128xbf16>
    %c6 = arith.constant 6 : index
    %c0_28 = arith.constant 0 : index
    %c0_29 = arith.constant 0 : index
    %32 = vector.load %arg1[%c6, %c0_28, %c0_29] : memref<9x128x32xbf16, #tpu.memory_space<vmem>>, vector<1x128x32xbf16>
    %33 = vector.shape_cast %32 : vector<1x128x32xbf16> to vector<128x32xbf16>
    %cst_30 = arith.constant dense<0.000000e+00> : vector<64x32xf32>
    %34 = tpu.matmul %31, %33, %cst_30 {dimension_numbers = #tpu.dot_dimension_numbers<[1], [0], [0], [1], [0, 0, 1, 1], [], []>} : vector<64x128xbf16>, vector<128x32xbf16>, vector<64x32xf32> -> vector<64x32xf32>
    %35 = arith.addf %30, %34 : vector<64x32xf32>
    %c19 = arith.constant 19 : index
    %c0_31 = arith.constant 0 : index
    %36 = vector.load %arg0[%c19, %c0_31] : memref<96x128xbf16, #tpu.memory_space<vmem>>, vector<64x128xbf16>
    %c7 = arith.constant 7 : index
    %c0_32 = arith.constant 0 : index
    %c0_33 = arith.constant 0 : index
    %37 = vector.load %arg1[%c7, %c0_32, %c0_33] : memref<9x128x32xbf16, #tpu.memory_space<vmem>>, vector<1x128x32xbf16>
    %38 = vector.shape_cast %37 : vector<1x128x32xbf16> to vector<128x32xbf16>
    %cst_34 = arith.constant dense<0.000000e+00> : vector<64x32xf32>
    %39 = tpu.matmul %36, %38, %cst_34 {dimension_numbers = #tpu.dot_dimension_numbers<[1], [0], [0], [1], [0, 0, 1, 1], [], []>} : vector<64x128xbf16>, vector<128x32xbf16>, vector<64x32xf32> -> vector<64x32xf32>
    %40 = arith.addf %35, %39 : vector<64x32xf32>
    %c20 = arith.constant 20 : index
    %c0_35 = arith.constant 0 : index
    %41 = vector.load %arg0[%c20, %c0_35] : memref<96x128xbf16, #tpu.memory_space<vmem>>, vector<64x128xbf16>
    %c8 = arith.constant 8 : index
    %c0_36 = arith.constant 0 : index
    %c0_37 = arith.constant 0 : index
    %42 = vector.load %arg1[%c8, %c0_36, %c0_37] : memref<9x128x32xbf16, #tpu.memory_space<vmem>>, vector<1x128x32xbf16>
    %43 = vector.shape_cast %42 : vector<1x128x32xbf16> to vector<128x32xbf16>
    %cst_38 = arith.constant dense<0.000000e+00> : vector<64x32xf32>
    %44 = tpu.matmul %41, %43, %cst_38 {dimension_numbers = #tpu.dot_dimension_numbers<[1], [0], [0], [1], [0, 0, 1, 1], [], []>} : vector<64x128xbf16>, vector<128x32xbf16>, vector<64x32xf32> -> vector<64x32xf32>
    %45 = arith.addf %40, %44 : vector<64x32xf32>
    %c0_39 = arith.constant 0 : index
    %c0_40 = arith.constant 0 : index
    %46 = vector.load %arg2[%c0_39, %c0_40] : memref<64x32xf32, #tpu.memory_space<vmem>>, vector<64x32xf32>
    tpu.vector_store %arg2[%c0_39, %c0_40], %45 {strides = array<i32>} : memref<64x32xf32, #tpu.memory_space<vmem>>, vector<64x32xf32>,
    return
  }
}

</mosaic_0001>

<bundles_post_ra>
// kernel: conv2d_195.1
= control target key start
LH: loop header
LB: loop body
LE: loop exit
PB: predicated region body
PF: predicated region fallthrough
CT: control target
= control target key end

     0   :  { %vm77_vm0 = vsmask.f32 7424  ;;  %vm369_vm1 = vcmask 1046528   ;;  %vm890_vm2 = vsmask.f32 6400  ;;  %vm1439_vm3 = vcmask 1045504   ;;  %s2796_s1 = inlined_call_operand.vmem [shape: bf16[9,128,32], index: 1, kind: input, shape index: {}]   ;;  %s2797_s0 = inlined_call_operand.vmem [shape: bf16[96,128], index: 0, kind: input, shape index: {}]   ;;  %s2798_s2 = inlined_call_operand.vmem [shape: f32[64,32], index: 2, kind: output, shape index: {}]  }
   0x1   :  { %v2211_v0 = vld [vmem:[%s2796_s1 + $0x40] sm:$0xff]   ;;  %v2213_v2 = vld [vmem:[%s2796_s1 + $0x48] sm:$0xff]   ;;  %v2215_v4 = vld [vmem:[%s2796_s1 + $0x50] sm:$0xff]   ;;  %vm1574_vm4 = vcmask 261120  }
   0x2   :  { %v2212_v1 = vld [vmem:[%s2796_s1 + $0x100] sm:$0xff]   ;;  %1915 = vmatprep.subr.bf16.mxu1 %v2211_v0  ;;  %v2214_v3 = vld [vmem:[%s2796_s1 + $0x108] sm:$0xff]   ;;  %v2216_v5 = vld [vmem:[%s2796_s1 + $0x110] sm:$0xff]  }
   0x3   :  { %2011 = vmatprep.subr.bf16.mxu0 %v2212_v1  ;;  %1916 = vmatpush3.bf16.msra.mxu1 %v2211_v0  ;;  %v2217_v6 = vld [vmem:[%s2796_s1 + $0x58] sm:$0xff]   ;;  %v2219_v8 = vld [vmem:[%s2796_s1 + $0x60] sm:$0xff]   ;;  %v2221_v10 = vld [vmem:[%s2796_s1 + $0x68] sm:$0xff]  }
   0x4   :  { %2012 = vmatpush3.bf16.msra.mxu0 %v2212_v1  ;;  %1917 = vmatprep.subr.bf16.mxu1 %v2213_v2  ;;  %v2218_v7 = vld [vmem:[%s2796_s1 + $0x118] sm:$0xff]   ;;  %v2220_v9 = vld [vmem:[%s2796_s1 + $0x120] sm:$0xff]   ;;  %v2222_v11 = vld [vmem:[%s2796_s1 + $0x128] sm:$0xff]  }
   0x5   :  { %2013 = vmatprep.subr.bf16.mxu0 %v2214_v3  ;;  %v12_v12 = vld [vmem:[%s2797_s0] sm:$0xf]  ;;  %v2360_v13 = vld [vmem:[%s2797_s0 + $0x4] sm:$0xf]  ;;  %v2368_v15 = vld [vmem:[%s2797_s0 + $0x8] sm:$0xff]  }
   0x6   :  { %v2363_v14 = vcombine.low %v12_v12, %v2360_v13  ;;  %v2223_v16 = vld [vmem:[%s2796_s1 + $0x70] sm:$0xff]   ;;  %v2376_v17 = vld [vmem:[%s2797_s0 + $0x8] sm:$0xf]  ;;  %v86_v20 = vshll.u32 %v2368_v15, 16  ;;  %v714_v22 = vld [vmem:[%s2797_s0 + $0x4] sm:$0xe] }
   0x7   :  { %1918 = vmatpush3.bf16.msra.mxu1 %v2213_v2  ;;  %v2384_v21 = vld [vmem:[%s2797_s0 + $0xc] sm:$0xff]   ;;  %v1694_v26 = vcombine.low %v714_v22, %v2376_v17  ;;  %v2225_v28 = vld [vmem:[%s2796_s1 + $0x78] sm:$0xff]   ;;  %v90_v32 = vshrl.u32 %v2368_v15, 16  ;;  %v2229_v40 = vld [vmem:[%s2796_s1] sm:$0xff]  }
   0x8   :  { %2014 = vmatpush3.bf16.msra.mxu0 %v2214_v3  ;;  %1919 = vmatprep.subr.bf16.mxu1 %v2215_v4  ;;  %v79_v18 = vshrl.u32 %v2363_v14, 16  ;;  %v81_v19 = vshll.u32 %v2363_v14, 16  ;;  %v2224_v23 = vld [vmem:[%s2796_s1 + $0x130] sm:$0xff]   ;;  %v88_v25 = vrot.slane %v86_v20, 1  ;;  %v736_v27 = vrot.slane %v2384_v21, 1  ;;  %v2226_v35 = vld [vmem:[%s2796_s1 + $0x138] sm:$0xff]  }
   0x9   :  { %2015 = vmatprep.subr.bf16.mxu0 %v2216_v5  ;;  %v2400_v29 = vld [vmem:[%s2797_s0 + $0x10] sm:$0xff]   ;;  %v735_v31 = vrot.slane %v1694_v26, 1  ;;  %v2232_v42 = vld [vmem:[%s2796_s1 + $0x140] sm:$0xff]   ;;  %v561_v43 = vshll.u32 %v2384_v21, 16  ;;  %v892_v44 = vshrl.u32 %v1694_v26, 16  ;;  %v565_v46 = vshrl.u32 %v2384_v21, 16 }
   0xa   :  { %v83_v24 = vrot.slane %v81_v19, 1  ;;  %v94_v33 = vshll.u32 %v2400_v29, 16  ;;  %v2407_v34 = vld [vmem:[%s2797_s0 + $0x14] sm:$0xff]   ;;  %v92_v38 = vor.u32 %v90_v32, %v88_v25  ;;  %v895_v47 = vshll.u32 %v1694_v26, 16  ;;  %v2235_v49 = vld [vmem:[%s2796_s1 + $0x8] sm:$0xff]   ;;  %v2448_v60 = vld [vmem:[%s2797_s0 + $0x1c] sm:$0xff]  }
   0xb   :  { %1920 = vmatpush3.bf16.msra.mxu1 %v2215_v4  ;;  %v737_v37 = vsel %vm369_vm1, %v735_v31, %v736_v27  ;;  %v738_v41 = vrot.slane %v2407_v34, 1  ;;  %v98_v50 = vshrl.u32 %v2400_v29, 16  ;;  %v2236_v51 = vld [vmem:[%s2796_s1 + $0x148] sm:$0xff]   ;;  %v894_v52 = vrot.slane %v892_v44, 1  ;;  %v2237_v53 = vld [vmem:[%s2796_s1 + $0x10] sm:$0xff]   ;;  %v2438_v54 = vld [vmem:[%s2797_s0 + $0x18] sm:$0xff]  }
   0xc   :  { %2016 = vmatpush3.bf16.msra.mxu0 %v2216_v5  ;;  %1921 = vmatprep.subr.bf16.mxu1 %v2217_v6  ;;  %v84_v30 = vor.u32 %v83_v24, %v79_v18  ;;  %v96_v39 = vrot.slane %v94_v33, 1  ;;  %v897_v55 = vrot.slane %v895_v47, 2  ;;  %v899_v56 = vrot.slane %v565_v46, 1  ;;  %v2238_v61 = vld [vmem:[%s2796_s1 + $0x150] sm:$0xff]   ;;  %v2239_v63 = vld [vmem:[%s2796_s1 + $0x18] sm:$0xff]   ;;  %v2241_v19 = vld [vmem:[%s2796_s1 + $0x20] sm:$0xff]  }
   0xd   :  { %2017 = vmatprep.subr.bf16.mxu0 %v2218_v7  ;;  %2027 = vmatprep.mubr.bf16.mxu0 %v737_v37  ;;  %v739_v48 = vsel %vm369_vm1, %v736_v27, %v738_v41  ;;  %v900_v57 = vrot.slane %v561_v43, 2  ;;  %v102_v59 = vshll.u32 %v2438_v54, 16  ;;  %v106_v62 = vshrl.u32 %v2438_v54, 16  ;;  %v2461_v2 = vld [vmem:[%s2797_s0 + $0x20] ss:$0 sps:$4 sm:$0x11]  }
   0xe   :  { %v89_v36 = vsel %vm77_vm0, %v84_v30, %v88_v25  ;;  %v97_v45 = vsel %vm77_vm0, %v92_v38, %v96_v39  ;;  %v100_v58 = vor.u32 %v98_v50, %v96_v39  ;;  %v740_v1 = vrot.slane %v2448_v60, 1  ;;  %v2466_v3 = vld [vmem:[%s2797_s0 + $0x24] ss:$0 sps:$4 sm:$0x11]   ;;  %v2244_v24 = vld [vmem:[%s2796_s1 + $0x168] sm:$0xff]   ;;  %v2248_v31 = vld [vmem:[%s2796_s1 + $0x170] sm:$0xff]  }
   0xf   :  { %1922 = vmatpush3.bf16.msra.mxu1 %v2217_v6  ;;  %1931 = vmatprep.mubr.bf16.mxu1 %v89_v36  ;;  %v104_v0 = vrot.slane %v102_v59, 1  ;;  %v898_v4 = vor.u32 %v897_v55, %v894_v52  ;;  %v2468_v5 = vor.u32 %v900_v57, %v899_v56  ;;  %v2240_v6 = vld [vmem:[%s2796_s1 + $0x158] sm:$0xff]   ;;  %v2242_v20 = vld [vmem:[%s2796_s1 + $0x160] sm:$0xff]   ;;  %v573_v25 = vshrl.u32 %v2407_v34, 16  ;;  %v2255_v57 = vld [vmem:[%s2796_s1 + $0x88] sm:$0xff]  }
  0x10   :  { %2018 = vmatpush3.bf16.msra.mxu0 %v2218_v7  ;;  %1923 = vmatprep.subr.bf16.mxu1 %v2219_v8  ;;  %v371_v26 = vrot.slane %v2368_v15, 1  ;;  %v373_v27 = vrot.slane %v2400_v29, 1  ;;  %v375_v30 = vrot.slane %v2438_v54, 1  ;;  %v577_v36 = vshll.u32 %v2448_v60, 16  ;;  %v2254_v55 = vld [vmem:[%s2796_s1 + $0x180] sm:$0xff]  }
  0x11   :  { %2019 = vmatprep.subr.bf16.mxu0 %v2220_v9  ;;  %v105_v7 = vsel %vm77_vm0, %v100_v58, %v104_v0  ;;  %v902_v18 = vsel %vm890_vm2, %v898_v4, %v2468_v5  ;;  %v903_v32 = vrot.slane %v573_v25, 1  ;;  %v2521_v37 = vrot.slane %v561_v43, 1  ;;  %v2252_v43 = vld [vmem:[%s2796_s1 + $0x178] sm:$0xff]   ;;  %v348_v56 = vld [vmem:[%s2797_s0] sm:$0xe] }
  0x12   :  { %v2508_v33 = vsel %vm369_vm1, %v371_v26, %v373_v27  ;;  %v581_v38 = vshrl.u32 %v2448_v60, 16 }
  0x13   :  { %1924 = vmatpush3.bf16.msra.mxu1 %v2219_v8  ;;  %v741_v8 = vsel %vm369_vm1, %v738_v41, %v740_v1  ;;  %v2267_v41 = vld [vmem:[%s2797_s0 + $0x24] ss:$0 sps:$4 sm:$0x33]  }
  0x14   :  { %2020 = vmatpush3.bf16.msra.mxu0 %v2220_v9  ;;  %1925 = vmatprep.subr.bf16.mxu1 %v2221_v10  ;;  %v108_v9 = vor.u32 %v106_v62, %v104_v0  ;;  %v912_v47 = vshrl.u32 %v2267_v41, 16  ;;  %v907_v50 = vrot.slane %v581_v38, 1  ;;  %v2256_v0 = vld [vmem:[%s2796_s1 + $0x188] sm:$0xff]  }
  0x15   :  { %2021 = vmatprep.subr.bf16.mxu0 %v2222_v11 }
  0x16   :  { %v914_v58 = vrot.slane %v912_v47, 1 }
  0x17   :  { %1926 = vmatpush3.bf16.msra.mxu1 %v2221_v10  ;;  %v110_v10 = vshll.u32 %v2461_v2, 16 }
  0x18   :  { %2022 = vmatpush3.bf16.msra.mxu0 %v2222_v11  ;;  %1927 = vmatprep.subr.bf16.mxu1 %v2223_v16  ;;  %v742_v11 = vrot.slane %v2466_v3, 1 }
  0x19   :  { %2023 = vmatprep.subr.bf16.mxu0 %v2224_v23  ;;  %v112_v12 = vrot.slane %v110_v10, 1 }
  0x1b   :  { %1928 = vmatpush3.bf16.msra.mxu1 %v2223_v16  ;;  %v743_v16 = vsel %vm369_vm1, %v740_v1, %v742_v11  ;;  %v113_v22 = vsel %vm77_vm0, %v108_v9, %v112_v12  ;;  %v1640_v1 = vcombine.low %v348_v56, %v2360_v13  ;;  %v2258_v13 = vld [vmem:[%s2796_s1 + $0x190] sm:$0xff]   ;;  %v2259_v12 = vld [vmem:[%s2796_s1 + $0x98] sm:$0xff]  }
  0x1c   :  { %2024 = vmatpush3.bf16.msra.mxu0 %v2224_v23  ;;  %1929 = vmatprep.subr.bf16.mxu1 %v2225_v28  ;;  %v2243_v23 = vld [vmem:[%s2796_s1 + $0x28] sm:$0xff]  }
  0x1d   :  { %2025 = vmatprep.subr.bf16.mxu0 %v2226_v35  ;;  %v370_v9 = vrot.slane %v1640_v1, 1 }
  0x1f   :  { %1930 = vmatpush3.bf16.msra.mxu1 %v2225_v28  ;;  %v569_v28 = vshll.u32 %v2407_v34, 16  ;;  %v2517_v34 = vsel %vm369_vm1, %v373_v27, %v375_v30 }
  0x20   :  { %2026 = vmatpush3.bf16.msra.mxu0 %v2226_v35  ;;  %1939 = vmatprep.subr.bf16.mxu1 %v2229_v40  ;;  %v2251_v35 = vld [vmem:[%s2796_s1 + $0x38] sm:$0xff]  }
  0x21   :  { %2035 = vmatprep.subr.bf16.mxu0 %v2232_v42  ;;  %v571_v39 = vrot.slane %v569_v28, 1 }
  0x22   :  { %1932 = vmatmul.mubr.bf16.vlgmr.msra.gmra.mrb[0].mxu1 %v97_v45  ;;  %v579_v45 = vrot.slane %v577_v36, 1 }
  0x23   :  { %1940 = vmatpush3.bf16.msra.mxu1 %v2229_v40  ;;  %2028 = vmatmul.mubr.bf16.vlgmr.msra.gmra.mrb[0].mxu0 %v739_v48  ;;  %v904_v40 = vrot.slane %v569_v28, 2  ;;  %v575_v44 = vor.u32 %v573_v25, %v571_v39  ;;  %v915_v48 = vshll.u32 %v2267_v41, 16  ;;  %v504_v25 = vld [vmem:[%s2797_s0 + $0x4] sm:$0xf] }
  0x24   :  { %2036 = vmatpush3.bf16.msra.mxu0 %v2232_v42  ;;  %1941 = vmatprep.subr.bf16.mxu1 %v2235_v49  ;;  %v567_v42 = vor.u32 %v565_v46, %v2521_v37  ;;  %v583_v21 = vor.u32 %v581_v38, %v579_v45  ;;  %v2253_v46 = vld [vmem:[%s2796_s1 + $0x80] sm:$0xff]   ;;  %v2269_v38 = vld [vmem:[%s2796_s1 + $0x1b8] sm:$0xff]  }
  0x25   :  { %2037 = vmatprep.subr.bf16.mxu0 %v2236_v51  ;;  %1935 = vmatprep.mubr.bf16.mxu1 %v105_v7  ;;  %v2537_v52 = vsel %vm77_vm0, %v575_v44, %v579_v45  ;;  %v917_v59 = vrot.slane %v915_v48, 2  ;;  %v2257_v7 = vld [vmem:[%s2796_s1 + $0x90] sm:$0xff]   ;;  %v2640_v41 = vld [vmem:[%s2797_s0 + $0x20] sm:$0xff]  }
  0x26   :  { %2031 = vmatprep.mubr.bf16.mxu0 %v741_v8  ;;  %v2274_v44 = vld [vmem:[%s2796_s1 + $0x1c0] sm:$0xff]   ;;  %v1099_v45 = vrot.slane %v2640_v41, 1 }
  0x27   :  { %1942 = vmatpush3.bf16.msra.mxu1 %v2235_v49  ;;  %v2534_v49 = vsel %vm77_vm0, %v567_v42, %v571_v39  ;;  %v918_v8 = vor.u32 %v917_v59, %v914_v58  ;;  %v2633_v39 = vld [vmem:[%s2797_s0 + $0x18] sm:$0xff]   ;;  %v2271_v42 = vld [vmem:[%s2796_s1 + $0xc0] sm:$0xff]  }
  0x28   :  { %2038 = vmatpush3.bf16.msra.mxu0 %v2236_v51  ;;  %1943 = vmatprep.subr.bf16.mxu1 %v2237_v53  ;;  %v908_v51 = vrot.slane %v577_v36, 2  ;;  %v2268_v36 = vld [vmem:[%s2796_s1 + $0xb8] sm:$0xff]  }
  0x29   :  { %2039 = vmatprep.subr.bf16.mxu0 %v2238_v61 }
  0x2a   :  { %1936 = vmatmul.mubr.bf16.gmra.mrb[4].mxu1 %v113_v22  ;;  %v909_v60 = vor.u32 %v908_v51, %v907_v50 }
  0x2b   :  { %1944 = vmatpush3.bf16.msra.mxu1 %v2237_v53  ;;  %2032 = vmatmul.mubr.bf16.gmra.mrb[4].mxu0 %v743_v16  ;;  %v905_v53 = vor.u32 %v904_v40, %v903_v32  ;;  %v2266_v32 = vld [vmem:[%s2796_s1 + $0x1b0] sm:$0xff]  }
  0x2c   :  { %2040 = vmatpush3.bf16.msra.mxu0 %v2238_v61  ;;  %1945 = vmatprep.subr.bf16.mxu1 %v2239_v63  ;;  %v1045_v61 = vld [vmem:[%s2797_s0 + $0x8] sm:$0xe]  ;;  %v919_v16 = vsel %vm890_vm2, %v909_v60, %v918_v8 }
  0x2d   :  { %2041 = vmatprep.subr.bf16.mxu0 %v2240_v6  ;;  %2051 = vmatprep.mubr.bf16.mxu0 %v902_v18  ;;  %v906_v62 = vsel %vm890_vm2, %v2468_v5, %v905_v53  ;;  %v910_v4 = vsel %vm890_vm2, %v905_v53, %v909_v60  ;;  %v585_v18 = vshll.u32 %v2466_v3, 16  ;;  %v2261_v3 = vld [vmem:[%s2796_s1 + $0xa0] sm:$0xff]   ;;  %v2277_v53 = vld [vmem:[%s2796_s1 + $0x1c8] sm:$0xff]  }
  0x2e   :  { %1955 = vmatprep.mubr.bf16.mxu1 %v2363_v14  ;;  %v2246_v14 = vld [vmem:[%s2796_s1 + $0x30] sm:$0xff]   ;;  %v2284_v8 = vld [vmem:[%s2796_s1 + $0xe8] sm:$0xff]  }
  0x2f   :  { %1946 = vmatpush3.bf16.msra.mxu1 %v2239_v63  ;;  %v2559_v63 = vld [vmem:[%s2797_s0 + $0xc] sm:$0xf]  ;;  %v587_v22 = vrot.slane %v585_v18, 1  ;;  %v1279_v18 = vshll.u32 %v2640_v41, 16 }
  0x30   :  { %2042 = vmatpush3.bf16.msra.mxu0 %v2240_v6  ;;  %1947 = vmatprep.subr.bf16.mxu1 %v2241_v19  ;;  %v2568_v5 = vcombine.low %v1045_v61, %v2559_v63  ;;  %v2573_v6 = vld [vmem:[%s2797_s0 + $0x10] sm:$0xff]  }
  0x31   :  { %2043 = vmatprep.subr.bf16.mxu0 %v2242_v20  ;;  %v1095_v11 = vrot.slane %v2573_v6, 1  ;;  %v1258_v48 = vshrl.u32 %v2573_v6, 16  ;;  %v1261_v50 = vshll.u32 %v2573_v6, 16  ;;  %v2278_v61 = vld [vmem:[%s2796_s1 + $0xd0] sm:$0xff]  }
  0x32   :  { %v1094_v10 = vrot.slane %v2568_v5, 1  ;;  %v1253_v47 = vshll.u32 %v2568_v5, 16 }
  0x33   :  { %1948 = vmatpush3.bf16.msra.mxu1 %v2241_v19  ;;  %v372_v19 = vsel %vm369_vm1, %v370_v9, %v371_v26  ;;  %v2264_v26 = vld [vmem:[%s2796_s1 + $0x1a8] sm:$0xff]   ;;  %v1260_v59 = vrot.slane %v1258_v48, 1  ;;  %v1263_v60 = vrot.slane %v1261_v50, 2  ;;  %v2287_v9 = vld [vmem:[%s2796_s1 + $0xf0] sm:$0xff]   ;;  %v2301_v48 = vld [vmem:[%s2796_s1 + $0x238] sm:$0xff]  }
  0x34   :  { %2044 = vmatpush3.bf16.msra.mxu0 %v2242_v20  ;;  %1949 = vmatprep.subr.bf16.mxu1 %v2243_v23  ;;  %v1096_v20 = vsel %vm369_vm1, %v1094_v10, %v1095_v11  ;;  %v1255_v58 = vrot.slane %v1253_v47, 2  ;;  %v1267_v10 = vshrl.u32 %v2633_v39, 16  ;;  %v2297_v47 = vld [vmem:[%s2796_s1 + $0x218] sm:$0xff]  }
  0x35   :  { %2045 = vmatprep.subr.bf16.mxu0 %v2244_v24  ;;  %v1264_v1 = vor.u32 %v1263_v60, %v1260_v59 }
  0x37   :  { %1950 = vmatpush3.bf16.msra.mxu1 %v2243_v23  ;;  %v2606_v23 = vsel %vm77_vm0, %v583_v21, %v587_v22  ;;  %v2276_v21 = vld [vmem:[%s2796_s1 + $0xc8] sm:$0xff]   ;;  %v2291_v22 = vld [vmem:[%s2796_s1 + $0x1f8] sm:$0xff]  }
  0x38   :  { %2046 = vmatpush3.bf16.msra.mxu0 %v2244_v24  ;;  %1951 = vmatprep.subr.bf16.mxu1 %v2246_v14  ;;  %v2263_v24 = vld [vmem:[%s2796_s1 + $0xa8] sm:$0xff]  }
  0x39   :  { %2047 = vmatprep.subr.bf16.mxu0 %v2248_v31 }
  0x3b   :  { %1952 = vmatpush3.bf16.msra.mxu1 %v2246_v14  ;;  %v1665_v14 = vcombine.low %v504_v25, %v2376_v17 }
  0x3c   :  { %2048 = vmatpush3.bf16.msra.mxu0 %v2248_v31  ;;  %1953 = vmatprep.subr.bf16.mxu1 %v2251_v35  ;;  %v2265_v31 = vld [vmem:[%s2796_s1 + $0xb0] sm:$0xff]  }
  0x3d   :  { %2049 = vmatprep.subr.bf16.mxu0 %v2252_v43  ;;  %v554_v27 = vshrl.u32 %v1665_v14, 16  ;;  %v556_v28 = vshll.u32 %v1665_v14, 16 }
  0x3f   :  { %1954 = vmatpush3.bf16.msra.mxu1 %v2251_v35  ;;  %v558_v35 = vrot.slane %v556_v28, 1 }
  0x40   :  { %2050 = vmatpush3.bf16.msra.mxu0 %v2252_v43  ;;  %1963 = vmatprep.subr.bf16.mxu1 %v2253_v46  ;;  %v1097_v43 = vrot.slane %v2633_v39, 1 }
  0x41   :  { %2059 = vmatprep.subr.bf16.mxu0 %v2254_v55  ;;  %v559_v17 = vor.u32 %v558_v35, %v554_v27  ;;  %v2294_v35 = vld [vmem:[%s2796_s1 + $0x208] sm:$0xff]  }
  0x42   :  { %1956 = vmatmul.mubr.bf16.vlgmr.msra.gmra.mrb[0].mxu1 %v2368_v15  ;;  %v2262_v15 = vld [vmem:[%s2796_s1 + $0x1a0] sm:$0xff]   ;;  %v1098_v51 = vsel %vm369_vm1, %v1095_v11, %v1097_v43  ;;  %v1270_v11 = vshll.u32 %v2633_v39, 16 }
  0x43   :  { %1964 = vmatpush3.bf16.msra.mxu1 %v2253_v46  ;;  %2052 = vmatmul.mubr.bf16.vlgmr.msra.gmra.mrb[0].mxu0 %v906_v62  ;;  %v564_v40 = vsel %vm77_vm0, %v559_v17, %v2521_v37  ;;  %v1250_v37 = vshrl.u32 %v2568_v5, 16  ;;  %v2288_v46 = vld [vmem:[%s2797_s0 + $0x28] ss:$0 sps:$4 sm:$0x11]  }
  0x44   :  { %2060 = vmatpush3.bf16.msra.mxu0 %v2254_v55  ;;  %1965 = vmatprep.subr.bf16.mxu1 %v2255_v57  ;;  %v377_v55 = vrot.slane %v2461_v2, 1  ;;  %v1101_v62 = vrot.slane %v2288_v46, 1  ;;  %v2279_v2 = vld [vmem:[%s2796_s1 + $0x1d0] sm:$0xff]  }
  0x45   :  { %2061 = vmatprep.subr.bf16.mxu0 %v2256_v0  ;;  %1959 = vmatprep.mubr.bf16.mxu1 %v2400_v29  ;;  %v2260_v29 = vld [vmem:[%s2796_s1 + $0x198] sm:$0xff]   ;;  %v1252_v56 = vrot.slane %v1250_v37, 1  ;;  %v1445_v37 = vrot.slane %v2640_v41, 2 }
  0x46   :  { %2055 = vmatprep.mubr.bf16.mxu0 %v910_v4  ;;  %v2280_v4 = vld [vmem:[%s2796_s1 + $0xd8] sm:$0xff]   ;;  %v1102_v5 = vsel %vm369_vm1, %v1099_v45, %v1101_v62 }
  0x47   :  { %1966 = vmatpush3.bf16.msra.mxu1 %v2255_v57  ;;  %v1100_v57 = vsel %vm369_vm1, %v1097_v43, %v1099_v45  ;;  %v2296_v43 = vld [vmem:[%s2796_s1 + $0x210] sm:$0xff]  }
  0x48   :  { %2062 = vmatpush3.bf16.msra.mxu0 %v2256_v0  ;;  %1967 = vmatprep.subr.bf16.mxu1 %v2257_v7  ;;  %v1256_v0 = vor.u32 %v1255_v58, %v1252_v56 }
  0x49   :  { %2063 = vmatprep.subr.bf16.mxu0 %v2258_v13 }
  0x4a   :  { %1960 = vmatmul.mubr.bf16.gmra.mrb[4].mxu1 %v2438_v54  ;;  %v1265_v54 = vsel %vm890_vm2, %v1256_v0, %v1264_v1 }
  0x4b   :  { %1968 = vmatpush3.bf16.msra.mxu1 %v2257_v7  ;;  %2056 = vmatmul.mubr.bf16.gmra.mrb[4].mxu0 %v919_v16  ;;  %v2283_v7 = vld [vmem:[%s2796_s1 + $0x1e0] sm:$0xff]   ;;  %v1276_v16 = vshrl.u32 %v2640_v41, 16  ;;  %v2300_v41 = vld [vmem:[%s2796_s1 + $0x230] sm:$0xff]  }
  0x4c   :  { %2064 = vmatpush3.bf16.msra.mxu0 %v2258_v13  ;;  %1969 = vmatprep.subr.bf16.mxu1 %v2259_v12  ;;  %v2285_v13 = vld [vmem:[%s2796_s1 + $0x1e8] sm:$0xff]  }
  0x4d   :  { %2065 = vmatprep.subr.bf16.mxu0 %v2260_v29  ;;  %1979 = vmatprep.mubr.bf16.mxu1 %v372_v19  ;;  %v1269_v19 = vrot.slane %v1267_v10, 1 }
  0x4e   :  { %2075 = vmatprep.mubr.bf16.mxu0 %v1096_v20  ;;  %v1272_v20 = vrot.slane %v1270_v11, 2 }
  0x4f   :  { %1970 = vmatpush3.bf16.msra.mxu1 %v2259_v12  ;;  %v2289_v12 = vld [vmem:[%s2796_s1 + $0x1f0] sm:$0xff]  }
  0x50   :  { %2066 = vmatpush3.bf16.msra.mxu0 %v2260_v29  ;;  %1971 = vmatprep.subr.bf16.mxu1 %v2261_v3  ;;  %v2290_v29 = vld [vmem:[%s2796_s1 + $0xf8] sm:$0xff]   ;;  %v1273_v25 = vor.u32 %v1272_v20, %v1269_v19 }
  0x51   :  { %2067 = vmatprep.subr.bf16.mxu0 %v2262_v15 }
  0x53   :  { %1972 = vmatpush3.bf16.msra.mxu1 %v2261_v3  ;;  %v2715_v3 = vld [vmem:[%s2797_s0 + $0x28] ss:$0 sps:$4 sm:$0x33]  }
  0x54   :  { %2068 = vmatpush3.bf16.msra.mxu0 %v2262_v15  ;;  %1973 = vmatprep.subr.bf16.mxu1 %v2263_v24  ;;  %v1278_v15 = vrot.slane %v1276_v16, 1  ;;  %v1285_v14 = vshrl.u32 %v2715_v3, 16  ;;  %v1288_v27 = vshll.u32 %v2715_v3, 16  ;;  %v1447_v50 = vrot.slane %v2715_v3, 2 }
  0x55   :  { %2069 = vmatprep.subr.bf16.mxu0 %v2264_v26 }
  0x56   :  { %v1290_v17 = vrot.slane %v1288_v27, 2 }
  0x57   :  { %1974 = vmatpush3.bf16.msra.mxu1 %v2263_v24  ;;  %v1281_v24 = vrot.slane %v1279_v18, 2 }
  0x58   :  { %2070 = vmatpush3.bf16.msra.mxu0 %v2264_v26  ;;  %1975 = vmatprep.subr.bf16.mxu1 %v2265_v31  ;;  %v2293_v26 = vld [vmem:[%s2796_s1 + $0x200] sm:$0xff]  }
  0x59   :  { %2071 = vmatprep.subr.bf16.mxu0 %v2266_v32  ;;  %v1282_v28 = vor.u32 %v1281_v24, %v1278_v15 }
  0x5b   :  { %1976 = vmatpush3.bf16.msra.mxu1 %v2265_v31  ;;  %v1418_v31 = vld [vmem:[%s2797_s0 + $0x8] sm:$0xc] }
  0x5c   :  { %2072 = vmatpush3.bf16.msra.mxu0 %v2266_v32  ;;  %1977 = vmatprep.subr.bf16.mxu1 %v2268_v36  ;;  %v1274_v32 = vsel %vm890_vm2, %v1264_v1, %v1273_v25 }
  0x5d   :  { %2073 = vmatprep.subr.bf16.mxu0 %v2269_v38 }
  0x5f   :  { %1978 = vmatpush3.bf16.msra.mxu1 %v2268_v36  ;;  %v1287_v36 = vrot.slane %v1285_v14, 1 }
  0x60   :  { %2074 = vmatpush3.bf16.msra.mxu0 %v2269_v38  ;;  %1987 = vmatprep.subr.bf16.mxu1 %v2271_v42  ;;  %v1798_v38 = vcombine.low %v1418_v31, %v2559_v63  ;;  %v1443_v63 = vrot.slane %v2633_v39, 2  ;;  %v2298_v39 = vld [vmem:[%s2796_s1 + $0x220] sm:$0xff]  }
  0x61   :  { %2083 = vmatprep.subr.bf16.mxu0 %v2274_v44 }
  0x62   :  { %1980 = vmatmul.mubr.bf16.vlgmr.msra.gmra.mrb[0].mxu1 %v2508_v33  ;;  %v378_v33 = vsel %vm369_vm1, %v375_v30, %v377_v55  ;;  %v2282_v30 = vld [vmem:[%s2796_s1 + $0xe0] sm:$0xff]  }
  0x63   :  { %1988 = vmatpush3.bf16.msra.mxu1 %v2271_v42  ;;  %2076 = vmatmul.mubr.bf16.vlgmr.msra.gmra.mrb[0].mxu0 %v1098_v51  ;;  %v1291_v42 = vor.u32 %v1290_v17, %v1287_v36  ;;  %v1448_v51 = vsel %vm1439_vm3, %v1445_v37, %v1447_v50 }
  0x64   :  { %2084 = vmatpush3.bf16.msra.mxu0 %v2274_v44  ;;  %1989 = vmatprep.subr.bf16.mxu1 %v2276_v21  ;;  %v1440_v44 = vrot.slane %v1798_v38, 2 }
  0x65   :  { %2085 = vmatprep.subr.bf16.mxu0 %v2277_v53  ;;  %1983 = vmatprep.mubr.bf16.mxu1 %v2517_v34  ;;  %v2281_v34 = vld [vmem:[%s2796_s1 + $0x1d8] sm:$0xff]   ;;  %v1292_v45 = vsel %vm890_vm2, %v1282_v28, %v1291_v42 }
  0x66   :  { %2079 = vmatprep.mubr.bf16.mxu0 %v1100_v57 }
  0x67   :  { %1990 = vmatpush3.bf16.msra.mxu1 %v2276_v21 }
  0x68   :  { %2086 = vmatpush3.bf16.msra.mxu0 %v2277_v53  ;;  %1991 = vmatprep.subr.bf16.mxu1 %v2278_v61 }
  0x69   :  { %2087 = vmatprep.subr.bf16.mxu0 %v2279_v2 }
  0x6a   :  { %1984 = vmatmul.mubr.bf16.gmra.mrb[4].mxu1 %v378_v33 }
  0x6b   :  { %1992 = vmatpush3.bf16.msra.mxu1 %v2278_v61  ;;  %2080 = vmatmul.mubr.bf16.gmra.mrb[4].mxu0 %v1102_v5 }
  0x6c   :  { %2088 = vmatpush3.bf16.msra.mxu0 %v2279_v2  ;;  %1993 = vmatprep.subr.bf16.mxu1 %v2280_v4 }
  0x6d   :  { %2089 = vmatprep.subr.bf16.mxu0 %v2281_v34  ;;  %2003 = vmatprep.mubr.bf16.mxu1 %v564_v40  ;;  %v1283_v40 = vsel %vm890_vm2, %v1273_v25, %v1282_v28 }
  0x6e   :  { %2099 = vmatprep.mubr.bf16.mxu0 %v1265_v54 }
  0x6f   :  { %1994 = vmatpush3.bf16.msra.mxu1 %v2280_v4 }
  0x70   :  { %2090 = vmatpush3.bf16.msra.mxu0 %v2281_v34  ;;  %1995 = vmatprep.subr.bf16.mxu1 %v2282_v30 }
  0x71   :  { %2091 = vmatprep.subr.bf16.mxu0 %v2283_v7 }
  0x73   :  { %1996 = vmatpush3.bf16.msra.mxu1 %v2282_v30 }
  0x74   :  { %2092 = vmatpush3.bf16.msra.mxu0 %v2283_v7  ;;  %1997 = vmatprep.subr.bf16.mxu1 %v2284_v8 }
  0x75   :  { %2093 = vmatprep.subr.bf16.mxu0 %v2285_v13 }
  0x77   :  { %1998 = vmatpush3.bf16.msra.mxu1 %v2284_v8 }
  0x78   :  { %2094 = vmatpush3.bf16.msra.mxu0 %v2285_v13  ;;  %1999 = vmatprep.subr.bf16.mxu1 %v2287_v9 }
  0x79   :  { %2095 = vmatprep.subr.bf16.mxu0 %v2289_v12 }
  0x7b   :  { %2000 = vmatpush3.bf16.msra.mxu1 %v2287_v9 }
  0x7c   :  { %2096 = vmatpush3.bf16.msra.mxu0 %v2289_v12  ;;  %2001 = vmatprep.subr.bf16.mxu1 %v2290_v29 }
  0x7d   :  { %2097 = vmatprep.subr.bf16.mxu0 %v2291_v22 }
  0x7f   :  { %2002 = vmatpush3.bf16.msra.mxu1 %v2290_v29 }
  0x80   :  { %2098 = vmatpush3.bf16.msra.mxu0 %v2291_v22  ;;  %2131 = vmatprep.subr.bf16.mxu1 %v2293_v26 }
  0x81   :  { %2107 = vmatprep.subr.bf16.mxu0 %v2293_v26 }
  0x82   :  { %2004 = vmatmul.mubr.bf16.vlgmr.msra.gmra.mrb[0].mxu1 %v2534_v49  ;;  %v1441_v49 = vrot.slane %v2573_v6, 2  ;;  %v1446_v6 = vsel %vm1439_vm3, %v1443_v63, %v1445_v37 }
  0x83   :  { %2100 = vmatmul.mubr.bf16.vlgmr.msra.gmra.mrb[0].mxu0 %v1274_v32  ;;  %2139 = vmatpush3.bf16.msra.mxu1 %v2293_v26 }
  0x84   :  { %2108 = vmatpush3.bf16.msra.mxu0 %v2293_v26  ;;  %2132 = vmatprep.subr.bf16.mxu1 %v2294_v35  ;;  %v1444_v21 = vsel %vm1439_vm3, %v1441_v49, %v1443_v63 }
  0x85   :  { %2109 = vmatprep.subr.bf16.mxu0 %v2294_v35  ;;  %2007 = vmatprep.mubr.bf16.mxu1 %v2537_v52  ;;  %v1442_v52 = vsel %vm1439_vm3, %v1440_v44, %v1441_v49 }
  0x86   :  { %2103 = vmatprep.mubr.bf16.mxu0 %v1283_v40 }
  0x87   :  { %2140 = vmatpush3.bf16.msra.mxu1 %v2294_v35 }
  0x88   :  { %2110 = vmatpush3.bf16.msra.mxu0 %v2294_v35  ;;  %2133 = vmatprep.subr.bf16.mxu1 %v2296_v43 }
  0x89   :  { %2111 = vmatprep.subr.bf16.mxu0 %v2296_v43 }
  0x8a   :  { %2008 = vmatmul.mubr.bf16.gmra.mrb[4].mxu1 %v2606_v23  ;;  %v2299_v23 = vld [vmem:[%s2796_s1 + $0x228] sm:$0xff]  }
  0x8b   :  { %2104 = vmatmul.mubr.bf16.gmra.mrb[4].mxu0 %v1292_v45  ;;  %2141 = vmatpush3.bf16.msra.mxu1 %v2296_v43 }
  0x8c   :  { %2112 = vmatpush3.bf16.msra.mxu0 %v2296_v43  ;;  %2134 = vmatprep.subr.bf16.mxu1 %v2297_v47 }
  0x8d   :  { %2113 = vmatprep.subr.bf16.mxu0 %v2297_v47  ;;  %2123 = vmatprep.mubr.bf16.mxu0 %v1442_v52 }
  0x8e   :  { %2127 = vmatprep.mubr.bf16.mxu1 %v1446_v6 }
  0x8f   :  { %2142 = vmatpush3.bf16.msra.mxu1 %v2297_v47 }
  0x90   :  { %2114 = vmatpush3.bf16.msra.mxu0 %v2297_v47  ;;  %2135 = vmatprep.subr.bf16.mxu1 %v2298_v39 }
  0x91   :  { %2115 = vmatprep.subr.bf16.mxu0 %v2298_v39 }
  0x93   :  { %2143 = vmatpush3.bf16.msra.mxu1 %v2298_v39 }
  0x94   :  { %2116 = vmatpush3.bf16.msra.mxu0 %v2298_v39  ;;  %2136 = vmatprep.subr.bf16.mxu1 %v2299_v23 }
  0x95   :  { %2117 = vmatprep.subr.bf16.mxu0 %v2299_v23 }
  0x97   :  { %2144 = vmatpush3.bf16.msra.mxu1 %v2299_v23 }
  0x98   :  { %2118 = vmatpush3.bf16.msra.mxu0 %v2299_v23  ;;  %2137 = vmatprep.subr.bf16.mxu1 %v2300_v41 }
  0x99   :  { %2119 = vmatprep.subr.bf16.mxu0 %v2300_v41 }
  0x9b   :  { %2145 = vmatpush3.bf16.msra.mxu1 %v2300_v41 }
  0x9c   :  { %2120 = vmatpush3.bf16.msra.mxu0 %v2300_v41  ;;  %2138 = vmatprep.subr.bf16.mxu1 %v2301_v48 }
  0x9d   :  { %2121 = vmatprep.subr.bf16.mxu0 %v2301_v48 }
  0x9f   :  { %2146 = vmatpush3.bf16.msra.mxu1 %v2301_v48 }
  0xa0   :  { %2122 = vmatpush3.bf16.msra.mxu0 %v2301_v48 }
  0xa2   :  { %2128 = vmatmul.mubr.bf16.vlgmr.msra.gmra.mrb[8].mxu1 %v1448_v51 }
  0xa3   :  { %2124 = vmatmul.mubr.bf16.vlgmr.msra.gmra.mrb[0].mxu0 %v1444_v21 }
 0x155   :  { %v2005_v46 = vpop.f32.mrb[0].mxu1 }
 0x156   :  { %v675_v53 = vpop.f32.mrb[1].mxu1 }
 0x157   :  { %v2006_v55 = vpop.f32.mrb[2].mxu1 }
 0x158   :  { %v678_v56 = vpop.f32.mrb[3].mxu1 }
 0x15d   :  { %v2009_v57 = vpop.f32.mrb[4].mxu1 }
 0x15e   :  { %v2105_v58 = vpop.f32.mrb[4].mxu0  ;;  %v691_v59 = vpop.f32.mrb[5].mxu1 }
 0x15f   :  { %v2151_v60 = vadd.f32 %v2105_v58, %v2009_v57  ;;  %v1395_v61 = vpop.f32.mrb[5].mxu0  ;;  %v2010_v62 = vpop.f32.mrb[6].mxu1 }
 0x160   :  { %v2153_v2 = vadd.f32 %v1395_v61, %v691_v59  ;;  %v2106_v33 = vpop.f32.mrb[6].mxu0  ;;  %v694_v0 = vpop.f32.mrb[7].mxu1 }
 0x161   :  { %v2155_v1 = vadd.f32 %v2106_v33, %v2010_v62  ;;  %v1398_v4 = vpop.f32.mrb[7].mxu0 }
 0x162   :  { %v2157_v5 = vadd.f32 %v1398_v4, %v694_v0 }
 0x175   :  { %v2129_v34 = vpop.f32.mrb[8].mxu1 }
 0x176   :  { %v2125_v54 = vpop.f32.mrb[0].mxu0  ;;  %v2152_v30 = vadd.f32 %v2151_v60, %v2129_v34  ;;  %v1551_v7 = vpop.f32.mrb[9].mxu1 }
 0x177   :  { %v2147_v8 = vadd.f32 %v2125_v54, %v2005_v46  ;;  %v1535_v13 = vpop.f32.mrb[1].mxu0  ;;  %v2154_v9 = vadd.f32 %v2153_v2, %v1551_v7  ;;  %v2130_v10 = vpop.f32.mrb[10].mxu1 }
 0x178   :  { %1581 = vst.msk [vmem:[%s2798_s2 + $0x30] sm:$0xff] %vm1574_vm4, %v2152_v30  ;;  %v2148_v11 = vadd.f32 %v1535_v13, %v675_v53  ;;  %v2126_v12 = vpop.f32.mrb[2].mxu0  ;;  %v2156_v16 = vadd.f32 %v2155_v1, %v2130_v10  ;;  %v1554_v18 = vpop.f32.mrb[11].mxu1 }
 0x179   :  { %1577 = vst.msk [vmem:[%s2798_s2 + $0x10] sm:$0xff] %vm1574_vm4, %v2147_v8  ;;  %1579 = vst.msk [vmem:[%s2798_s2 + $0x20] sm:$0xff] %vm1574_vm4, %v2154_v9  ;;  %v2149_v29 = vadd.f32 %v2126_v12, %v2006_v55  ;;  %v1538_v19 = vpop.f32.mrb[3].mxu0  ;;  %v2158_v20 = vadd.f32 %v2157_v5, %v1554_v18 }
 0x17a   :  { %1575 = vst.msk [vmem:[%s2798_s2] sm:$0xff] %vm1574_vm4, %v2148_v11  ;;  %1582 = vst.msk [vmem:[%s2798_s2 + $0x38] sm:$0xff] %vm1574_vm4, %v2156_v16  ;;  %v2150_v3 = vadd.f32 %v1538_v19, %v678_v56 }
 0x17b   :  { %1578 = vst.msk [vmem:[%s2798_s2 + $0x18] sm:$0xff] %vm1574_vm4, %v2149_v29  ;;  %1580 = vst.msk [vmem:[%s2798_s2 + $0x28] sm:$0xff] %vm1574_vm4, %v2158_v20 }
 0x17c   :  { %1576 = vst.msk [vmem:[%s2798_s2 + $0x8] sm:$0xff] %vm1574_vm4, %v2150_v3 }

</bundles_post_ra>
